<compile_context>
chip_gen: v5e
topology: v5e:2x2
jax: 0.10.0
libtpu: 0.0.40
codegen_flags: <defaults>
</compile_context>

<pallas_src>
import jax
import jax.numpy as jnp
from jax.experimental import pallas as pl
from jax.experimental.pallas import tpu as pltpu


# ------------------------------------------------------------------ #
# Fused photometric-distortion kernel
#   params_ref (SMEM, f32[6]):
#     [0] brightness factor   (1.0 => identity)
#     [1] contrast factor applied BEFORE saturation/hue (1.0 => identity)
#     [2] saturation factor   (1.0 => identity)
#     [3] hue shift delta
#     [4] hue-enable flag     (0.0 / 1.0)
#     [5] contrast factor applied AFTER saturation/hue  (1.0 => identity)
#   perm_ref   (SMEM, i32[3]): output-channel -> input-channel permutation
#   img_ref    (VMEM, f32[3, H, W]) in [0, 1]
#   out_ref    (VMEM, f32[3, H, W])
# ------------------------------------------------------------------ #
def _photometric_kernel(params_ref, perm_ref, img_ref, out_ref):
    _, H, W = img_ref.shape
    inv_hw = 1.0 / float(H * W)

    fb = params_ref[0]
    fc_before = params_ref[1]
    fs = params_ref[2]
    dh = params_ref[3]
    use_hue = params_ref[4]
    fc_after = params_ref[5]

    r = img_ref[0]
    g = img_ref[1]
    b = img_ref[2]

    def clamp01(x):
        return jnp.clip(x, 0.0, 1.0)

    def gray(rr, gg, bb):
        # torchvision rgb_to_grayscale coefficients
        return 0.2989 * rr + 0.587 * gg + 0.114 * bb

    # -------- brightness: blend with zeros, clamp --------
    r = clamp01(fb * r)
    g = clamp01(fb * g)
    b = clamp01(fb * b)

    # -------- contrast: blend with scalar mean of grayscale --------
    def contrast(rr, gg, bb, f):
        m = jnp.sum(gray(rr, gg, bb)) * inv_hw  # scalar mean over H*W
        one_m_f = 1.0 - f
        return (clamp01(f * rr + one_m_f * m),
                clamp01(f * gg + one_m_f * m),
                clamp01(f * bb + one_m_f * m))

    r, g, b = contrast(r, g, b, fc_before)

    # -------- saturation: blend with per-pixel grayscale --------
    gr = gray(r, g, b)
    one_m_fs = 1.0 - fs
    r = clamp01(fs * r + one_m_fs * gr)
    g = clamp01(fs * g + one_m_fs * gr)
    b = clamp01(fs * b + one_m_fs * gr)

    # -------- hue: rgb -> hsv, shift h, hsv -> rgb (torchvision math) --------
    maxc = jnp.maximum(jnp.maximum(r, g), b)
    minc = jnp.minimum(jnp.minimum(r, g), b)
    eqc = maxc == minc
    cr = maxc - minc
    ones = jnp.ones_like(maxc)
    s = cr / jnp.where(eqc, ones, maxc)
    crd = jnp.where(eqc, ones, cr)
    rc = (maxc - r) / crd
    gc = (maxc - g) / crd
    bc = (maxc - b) / crd
    is_r = (maxc == r).astype(jnp.float32)
    is_g = jnp.logical_and(maxc == g, maxc != r).astype(jnp.float32)
    is_b = jnp.logical_and(maxc != g, maxc != r).astype(jnp.float32)
    h = is_r * (bc - gc) + is_g * (2.0 + rc - bc) + is_b * (4.0 + gc - rc)
    h = h / 6.0 + 1.0
    h = h - jnp.floor(h)          # == fmod(h/6 + 1, 1)
    h = h + dh
    h = h - jnp.floor(h)          # == (h + dh) % 1.0

    v = maxc
    h6 = h * 6.0
    i_f = jnp.floor(h6)
    fpart = h6 - i_f
    i_f = jnp.where(i_f >= 6.0, i_f - 6.0, i_f)   # guard fp edge at h ~= 1
    p_ = clamp01(v * (1.0 - s))
    q_ = clamp01(v * (1.0 - s * fpart))
    t_ = clamp01(v * (1.0 - s * (1.0 - fpart)))
    m0 = (i_f == 0.0).astype(jnp.float32)
    m1 = (i_f == 1.0).astype(jnp.float32)
    m2 = (i_f == 2.0).astype(jnp.float32)
    m3 = (i_f == 3.0).astype(jnp.float32)
    m4 = (i_f == 4.0).astype(jnp.float32)
    m5 = (i_f == 5.0).astype(jnp.float32)
    r_h = m0 * v + m1 * q_ + m2 * p_ + m3 * p_ + m4 * t_ + m5 * v
    g_h = m0 * t_ + m1 * v + m2 * v + m3 * q_ + m4 * p_ + m5 * p_
    b_h = m0 * p_ + m1 * p_ + m2 * t_ + m3 * v + m4 * v + m5 * q_

    not_hue = 1.0 - use_hue
    r = use_hue * r_h + not_hue * r
    g = use_hue * g_h + not_hue * g
    b = use_hue * b_h + not_hue * b

    # -------- contrast (when applied after saturation/hue) --------
    r, g, b = contrast(r, g, b, fc_after)

    # -------- channel permutation (identity if not applied) --------
    def pick(idx):
        w0 = (idx == 0).astype(jnp.float32)
        w1 = (idx == 1).astype(jnp.float32)
        w2 = 1.0 - w0 - w1
        return w0 * r + w1 * g + w2 * b

    out_ref[0] = pick(perm_ref[0])
    out_ref[1] = pick(perm_ref[1])
    out_ref[2] = pick(perm_ref[2])


# ------------------------------------------------------------------ #
# Wrapper: sample randomness, fold decisions into effective params,
# launch the single fused kernel.
# ------------------------------------------------------------------ #
def random_photometric_distort(image_chw, key, target=None, *,
                               contrast=(0.5, 1.5), saturation=(0.5, 1.5),
                               hue=(-0.05, 0.05), brightness=(0.875, 1.125),
                               p=0.5):
    """image_chw: (3, H, W) float32 in [0, 1]. Returns (image, target)."""
    if image_chw.ndim == 2:
        image_chw = image_chw[None]
    C, H, W = image_chw.shape
    assert C == 3, "kernel implements the RGB (3-channel) path"
    # TODO(synk): 1-channel images (torchvision returns them unchanged for
    #             saturation/hue) are not handled by this kernel.

    kr, kb, kc, ks, kh, kp = jax.random.split(key, 6)
    r = jax.random.uniform(kr, (7,), jnp.float32)
    fb = jax.random.uniform(kb, (), jnp.float32, brightness[0], brightness[1])
    fc = jax.random.uniform(kc, (), jnp.float32, contrast[0], contrast[1])
    fs = jax.random.uniform(ks, (), jnp.float32, saturation[0], saturation[1])
    dh = jax.random.uniform(kh, (), jnp.float32, hue[0], hue[1])
    perm_rand = jax.random.permutation(kp, C).astype(jnp.int32)

    apply_b = r[0] < p
    contrast_before = r[1] < 0.5
    apply_c_before = jnp.logical_and(contrast_before, r[2] < p)
    apply_s = r[3] < p
    apply_h = r[4] < p
    apply_c_after = jnp.logical_and(jnp.logical_not(contrast_before), r[5] < p)
    apply_perm = r[6] < p

    one = jnp.float32(1.0)
    params = jnp.stack([
        jnp.where(apply_b, fb, one),
        jnp.where(apply_c_before, fc, one),
        jnp.where(apply_s, fs, one),
        dh,
        apply_h.astype(jnp.float32),
        jnp.where(apply_c_after, fc, one),
    ]).astype(jnp.float32)
    perm = jnp.where(apply_perm, perm_rand,
                     jnp.arange(C, dtype=jnp.int32)).astype(jnp.int32)

    out = pl.pallas_call(
        _photometric_kernel,
        out_shape=jax.ShapeDtypeStruct((C, H, W), jnp.float32),
        in_specs=[
            pl.BlockSpec(memory_space=pltpu.MemorySpace.SMEM),   # params
            pl.BlockSpec(memory_space=pltpu.MemorySpace.SMEM),   # perm
            pl.BlockSpec(memory_space=pltpu.MemorySpace.VMEM),   # image
        ],
        out_specs=pl.BlockSpec(memory_space=pltpu.MemorySpace.VMEM),
    )(params, perm, image_chw.astype(jnp.float32))

    return out, target


if __name__ == "__main__":
    key = jax.random.PRNGKey(0)
    k_img, k_rand = jax.random.split(key)

    C, H, W = 3, 16, 128   # W multiple of 128 -> lane-dense unmasked stores
    image = jax.random.uniform(k_img, (C, H, W), jnp.float32)  # float RGB in [0,1]
    target = {"labels": jnp.arange(4, dtype=jnp.int32)}

    img_out, tgt_out = random_photometric_distort(image, k_rand, target)
    jax.block_until_ready(img_out)

    assert img_out.shape == (C, H, W)
    assert bool(jnp.all(jnp.isfinite(img_out)))
    assert bool(jnp.all(img_out >= -1e-6)) and bool(jnp.all(img_out <= 1.0 + 1e-6))
    assert tgt_out is target

    print("KERNEL_OK")
</pallas_src>

<mosaic_0001>
module attributes {stable_mosaic.version = 11 : i64} {
  func.func @_photometric_kernel(%arg0: memref<6xf32, #tpu.memory_space<smem>>, %arg1: memref<3xi32, #tpu.memory_space<smem>>, %arg2: memref<3x16x128xf32, #tpu.memory_space<vmem>>, %arg3: memref<3x16x128xf32, #tpu.memory_space<vmem>>) attributes {dimension_semantics = [], scalar_prefetch = 0 : i64, scratch_operands = 0 : i64, tpu.core_type = #tpu.core_type<tc>} {
    %c0 = arith.constant 0 : index
    %0 = memref.load %arg0[%c0] : memref<6xf32, #tpu.memory_space<smem>>
    %c1 = arith.constant 1 : index
    %1 = memref.load %arg0[%c1] : memref<6xf32, #tpu.memory_space<smem>>
    %c2 = arith.constant 2 : index
    %2 = memref.load %arg0[%c2] : memref<6xf32, #tpu.memory_space<smem>>
    %c3 = arith.constant 3 : index
    %3 = memref.load %arg0[%c3] : memref<6xf32, #tpu.memory_space<smem>>
    %c4 = arith.constant 4 : index
    %4 = memref.load %arg0[%c4] : memref<6xf32, #tpu.memory_space<smem>>
    %c5 = arith.constant 5 : index
    %5 = memref.load %arg0[%c5] : memref<6xf32, #tpu.memory_space<smem>>
    %c0_0 = arith.constant 0 : index
    %c0_1 = arith.constant 0 : index
    %c0_2 = arith.constant 0 : index
    %6 = vector.load %arg2[%c0_0, %c0_1, %c0_2] : memref<3x16x128xf32, #tpu.memory_space<vmem>>, vector<1x16x128xf32>
    %7 = vector.shape_cast %6 : vector<1x16x128xf32> to vector<16x128xf32>
    %c1_3 = arith.constant 1 : index
    %c0_4 = arith.constant 0 : index
    %c0_5 = arith.constant 0 : index
    %8 = vector.load %arg2[%c1_3, %c0_4, %c0_5] : memref<3x16x128xf32, #tpu.memory_space<vmem>>, vector<1x16x128xf32>
    %9 = vector.shape_cast %8 : vector<1x16x128xf32> to vector<16x128xf32>
    %c2_6 = arith.constant 2 : index
    %c0_7 = arith.constant 0 : index
    %c0_8 = arith.constant 0 : index
    %10 = vector.load %arg2[%c2_6, %c0_7, %c0_8] : memref<3x16x128xf32, #tpu.memory_space<vmem>>, vector<1x16x128xf32>
    %11 = vector.shape_cast %10 : vector<1x16x128xf32> to vector<16x128xf32>
    %12 = vector.broadcast %0 : f32 to vector<16x128xf32>
    %13 = arith.mulf %12, %7 : vector<16x128xf32>
    %cst = arith.constant 0.000000e+00 : f32
    %cst_9 = arith.constant 1.000000e+00 : f32
    %14 = vector.broadcast %cst : f32 to vector<16x128xf32>
    %15 = arith.maximumf %14, %13 : vector<16x128xf32>
    %16 = vector.broadcast %cst_9 : f32 to vector<16x128xf32>
    %17 = arith.minimumf %16, %15 : vector<16x128xf32>
    %18 = vector.broadcast %0 : f32 to vector<16x128xf32>
    %19 = arith.mulf %18, %9 : vector<16x128xf32>
    %cst_10 = arith.constant 0.000000e+00 : f32
    %cst_11 = arith.constant 1.000000e+00 : f32
    %20 = vector.broadcast %cst_10 : f32 to vector<16x128xf32>
    %21 = arith.maximumf %20, %19 : vector<16x128xf32>
    %22 = vector.broadcast %cst_11 : f32 to vector<16x128xf32>
    %23 = arith.minimumf %22, %21 : vector<16x128xf32>
    %24 = vector.broadcast %0 : f32 to vector<16x128xf32>
    %25 = arith.mulf %24, %11 : vector<16x128xf32>
    %cst_12 = arith.constant 0.000000e+00 : f32
    %cst_13 = arith.constant 1.000000e+00 : f32
    %26 = vector.broadcast %cst_12 : f32 to vector<16x128xf32>
    %27 = arith.maximumf %26, %25 : vector<16x128xf32>
    %28 = vector.broadcast %cst_13 : f32 to vector<16x128xf32>
    %29 = arith.minimumf %28, %27 : vector<16x128xf32>
    %cst_14 = arith.constant 2.989000e-01 : f32
    %30 = vector.broadcast %cst_14 : f32 to vector<16x128xf32>
    %31 = arith.mulf %30, %17 : vector<16x128xf32>
    %cst_15 = arith.constant 5.870000e-01 : f32
    %32 = vector.broadcast %cst_15 : f32 to vector<16x128xf32>
    %33 = arith.mulf %32, %23 : vector<16x128xf32>
    %34 = arith.addf %31, %33 : vector<16x128xf32>
    %cst_16 = arith.constant 1.140000e-01 : f32
    %35 = vector.broadcast %cst_16 : f32 to vector<16x128xf32>
    %36 = arith.mulf %35, %29 : vector<16x128xf32>
    %37 = arith.addf %34, %36 : vector<16x128xf32>
    %38 = vector.shape_cast %37 : vector<16x128xf32> to vector<1x16x128xf32>
    %cst_17 = arith.constant dense<0.000000e+00> : vector<1xf32>
    %39 = vector.multi_reduction <add>, %38, %cst_17 [1, 2] : vector<1x16x128xf32> to vector<1xf32>
    %40 = vector.shape_cast %39 : vector<1xf32> to vector<1x1x1xf32>
    %41 = vector.extract %40[0, 0, 0] : f32 from vector<1x1x1xf32>
    %cst_18 = arith.constant 4.8828125E-4 : f32
    %42 = arith.mulf %41, %cst_18 : f32
    %cst_19 = arith.constant 1.000000e+00 : f32
    %43 = arith.subf %cst_19, %1 : f32
    %44 = vector.broadcast %1 : f32 to vector<16x128xf32>
    %45 = arith.mulf %44, %17 : vector<16x128xf32>
    %46 = arith.mulf %43, %42 : f32
    %47 = vector.broadcast %46 : f32 to vector<16x128xf32>
    %48 = arith.addf %45, %47 : vector<16x128xf32>
    %cst_20 = arith.constant 0.000000e+00 : f32
    %cst_21 = arith.constant 1.000000e+00 : f32
    %49 = vector.broadcast %cst_20 : f32 to vector<16x128xf32>
    %50 = arith.maximumf %49, %48 : vector<16x128xf32>
    %51 = vector.broadcast %cst_21 : f32 to vector<16x128xf32>
    %52 = arith.minimumf %51, %50 : vector<16x128xf32>
    %53 = vector.broadcast %1 : f32 to vector<16x128xf32>
    %54 = arith.mulf %53, %23 : vector<16x128xf32>
    %55 = arith.mulf %43, %42 : f32
    %56 = vector.broadcast %55 : f32 to vector<16x128xf32>
    %57 = arith.addf %54, %56 : vector<16x128xf32>
    %cst_22 = arith.constant 0.000000e+00 : f32
    %cst_23 = arith.constant 1.000000e+00 : f32
    %58 = vector.broadcast %cst_22 : f32 to vector<16x128xf32>
    %59 = arith.maximumf %58, %57 : vector<16x128xf32>
    %60 = vector.broadcast %cst_23 : f32 to vector<16x128xf32>
    %61 = arith.minimumf %60, %59 : vector<16x128xf32>
    %62 = vector.broadcast %1 : f32 to vector<16x128xf32>
    %63 = arith.mulf %62, %29 : vector<16x128xf32>
    %64 = arith.mulf %43, %42 : f32
    %65 = vector.broadcast %64 : f32 to vector<16x128xf32>
    %66 = arith.addf %63, %65 : vector<16x128xf32>
    %cst_24 = arith.constant 0.000000e+00 : f32
    %cst_25 = arith.constant 1.000000e+00 : f32
    %67 = vector.broadcast %cst_24 : f32 to vector<16x128xf32>
    %68 = arith.maximumf %67, %66 : vector<16x128xf32>
    %69 = vector.broadcast %cst_25 : f32 to vector<16x128xf32>
    %70 = arith.minimumf %69, %68 : vector<16x128xf32>
    %cst_26 = arith.constant 2.989000e-01 : f32
    %71 = vector.broadcast %cst_26 : f32 to vector<16x128xf32>
    %72 = arith.mulf %71, %52 : vector<16x128xf32>
    %cst_27 = arith.constant 5.870000e-01 : f32
    %73 = vector.broadcast %cst_27 : f32 to vector<16x128xf32>
    %74 = arith.mulf %73, %61 : vector<16x128xf32>
    %75 = arith.addf %72, %74 : vector<16x128xf32>
    %cst_28 = arith.constant 1.140000e-01 : f32
    %76 = vector.broadcast %cst_28 : f32 to vector<16x128xf32>
    %77 = arith.mulf %76, %70 : vector<16x128xf32>
    %78 = arith.addf %75, %77 : vector<16x128xf32>
    %cst_29 = arith.constant 1.000000e+00 : f32
    %79 = arith.subf %cst_29, %2 : f32
    %80 = vector.broadcast %2 : f32 to vector<16x128xf32>
    %81 = arith.mulf %80, %52 : vector<16x128xf32>
    %82 = vector.broadcast %79 : f32 to vector<16x128xf32>
    %83 = arith.mulf %82, %78 : vector<16x128xf32>
    %84 = arith.addf %81, %83 : vector<16x128xf32>
    %cst_30 = arith.constant 0.000000e+00 : f32
    %cst_31 = arith.constant 1.000000e+00 : f32
    %85 = vector.broadcast %cst_30 : f32 to vector<16x128xf32>
    %86 = arith.maximumf %85, %84 : vector<16x128xf32>
    %87 = vector.broadcast %cst_31 : f32 to vector<16x128xf32>
    %88 = arith.minimumf %87, %86 : vector<16x128xf32>
    %89 = vector.broadcast %2 : f32 to vector<16x128xf32>
    %90 = arith.mulf %89, %61 : vector<16x128xf32>
    %91 = vector.broadcast %79 : f32 to vector<16x128xf32>
    %92 = arith.mulf %91, %78 : vector<16x128xf32>
    %93 = arith.addf %90, %92 : vector<16x128xf32>
    %cst_32 = arith.constant 0.000000e+00 : f32
    %cst_33 = arith.constant 1.000000e+00 : f32
    %94 = vector.broadcast %cst_32 : f32 to vector<16x128xf32>
    %95 = arith.maximumf %94, %93 : vector<16x128xf32>
    %96 = vector.broadcast %cst_33 : f32 to vector<16x128xf32>
    %97 = arith.minimumf %96, %95 : vector<16x128xf32>
    %98 = vector.broadcast %2 : f32 to vector<16x128xf32>
    %99 = arith.mulf %98, %70 : vector<16x128xf32>
    %100 = vector.broadcast %79 : f32 to vector<16x128xf32>
    %101 = arith.mulf %100, %78 : vector<16x128xf32>
    %102 = arith.addf %99, %101 : vector<16x128xf32>
    %cst_34 = arith.constant 0.000000e+00 : f32
    %cst_35 = arith.constant 1.000000e+00 : f32
    %103 = vector.broadcast %cst_34 : f32 to vector<16x128xf32>
    %104 = arith.maximumf %103, %102 : vector<16x128xf32>
    %105 = vector.broadcast %cst_35 : f32 to vector<16x128xf32>
    %106 = arith.minimumf %105, %104 : vector<16x128xf32>
    %107 = arith.maximumf %88, %97 : vector<16x128xf32>
    %108 = arith.maximumf %107, %106 : vector<16x128xf32>
    %109 = arith.minimumf %88, %97 : vector<16x128xf32>
    %110 = arith.minimumf %109, %106 : vector<16x128xf32>
    %111 = arith.cmpf oeq, %108, %110 : vector<16x128xf32>
    %112 = arith.subf %108, %110 : vector<16x128xf32>
    %cst_36 = arith.constant 1.000000e+00 : f32
    %113 = vector.broadcast %cst_36 : f32 to vector<16x128xf32>
    %114 = arith.select %111, %113, %108 : vector<16x128xi1>, vector<16x128xf32>
    %115 = arith.divf %112, %114 : vector<16x128xf32>
    %116 = arith.select %111, %113, %112 : vector<16x128xi1>, vector<16x128xf32>
    %117 = arith.subf %108, %88 : vector<16x128xf32>
    %118 = arith.divf %117, %116 : vector<16x128xf32>
    %119 = arith.subf %108, %97 : vector<16x128xf32>
    %120 = arith.divf %119, %116 : vector<16x128xf32>
    %121 = arith.subf %108, %106 : vector<16x128xf32>
    %122 = arith.divf %121, %116 : vector<16x128xf32>
    %123 = arith.cmpf oeq, %108, %88 : vector<16x128xf32>
    %124 = arith.extui %123 : vector<16x128xi1> to vector<16x128xi32>
    %125 = arith.sitofp %124 : vector<16x128xi32> to vector<16x128xf32>
    %126 = arith.cmpf oeq, %108, %97 : vector<16x128xf32>
    %127 = arith.cmpf one, %108, %88 : vector<16x128xf32>
    %128 = arith.andi %126, %127 : vector<16x128xi1>
    %129 = arith.extui %128 : vector<16x128xi1> to vector<16x128xi32>
    %130 = arith.sitofp %129 : vector<16x128xi32> to vector<16x128xf32>
    %131 = arith.cmpf one, %108, %97 : vector<16x128xf32>
    %132 = arith.cmpf one, %108, %88 : vector<16x128xf32>
    %133 = arith.andi %131, %132 : vector<16x128xi1>
    %134 = arith.extui %133 : vector<16x128xi1> to vector<16x128xi32>
    %135 = arith.sitofp %134 : vector<16x128xi32> to vector<16x128xf32>
    %136 = arith.subf %122, %120 : vector<16x128xf32>
    %137 = arith.mulf %125, %136 : vector<16x128xf32>
    %cst_37 = arith.constant 2.000000e+00 : f32
    %138 = vector.broadcast %cst_37 : f32 to vector<16x128xf32>
    %139 = arith.addf %138, %118 : vector<16x128xf32>
    %140 = arith.subf %139, %122 : vector<16x128xf32>
    %141 = arith.mulf %130, %140 : vector<16x128xf32>
    %142 = arith.addf %137, %141 : vector<16x128xf32>
    %cst_38 = arith.constant 4.000000e+00 : f32
    %143 = vector.broadcast %cst_38 : f32 to vector<16x128xf32>
    %144 = arith.addf %143, %120 : vector<16x128xf32>
    %145 = arith.subf %144, %118 : vector<16x128xf32>
    %146 = arith.mulf %135, %145 : vector<16x128xf32>
    %147 = arith.addf %142, %146 : vector<16x128xf32>
    %cst_39 = arith.constant 6.000000e+00 : f32
    %148 = vector.broadcast %cst_39 : f32 to vector<16x128xf32>
    %149 = arith.divf %147, %148 : vector<16x128xf32>
    %cst_40 = arith.constant 1.000000e+00 : f32
    %150 = vector.broadcast %cst_40 : f32 to vector<16x128xf32>
    %151 = arith.addf %149, %150 : vector<16x128xf32>
    %152 = math.floor %151 : vector<16x128xf32>
    %153 = arith.subf %151, %152 : vector<16x128xf32>
    %154 = vector.broadcast %3 : f32 to vector<16x128xf32>
    %155 = arith.addf %153, %154 : vector<16x128xf32>
    %156 = math.floor %155 : vector<16x128xf32>
    %157 = arith.subf %155, %156 : vector<16x128xf32>
    %cst_41 = arith.constant 6.000000e+00 : f32
    %158 = vector.broadcast %cst_41 : f32 to vector<16x128xf32>
    %159 = arith.mulf %157, %158 : vector<16x128xf32>
    %160 = math.floor %159 : vector<16x128xf32>
    %161 = arith.subf %159, %160 : vector<16x128xf32>
    %cst_42 = arith.constant 6.000000e+00 : f32
    %162 = vector.broadcast %cst_42 : f32 to vector<16x128xf32>
    %163 = arith.cmpf oge, %160, %162 : vector<16x128xf32>
    %cst_43 = arith.constant 6.000000e+00 : f32
    %164 = vector.broadcast %cst_43 : f32 to vector<16x128xf32>
    %165 = arith.subf %160, %164 : vector<16x128xf32>
    %166 = arith.select %163, %165, %160 : vector<16x128xi1>, vector<16x128xf32>
    %cst_44 = arith.constant 1.000000e+00 : f32
    %167 = vector.broadcast %cst_44 : f32 to vector<16x128xf32>
    %168 = arith.subf %167, %115 : vector<16x128xf32>
    %169 = arith.mulf %108, %168 : vector<16x128xf32>
    %cst_45 = arith.constant 0.000000e+00 : f32
    %cst_46 = arith.constant 1.000000e+00 : f32
    %170 = vector.broadcast %cst_45 : f32 to vector<16x128xf32>
    %171 = arith.maximumf %170, %169 : vector<16x128xf32>
    %172 = vector.broadcast %cst_46 : f32 to vector<16x128xf32>
    %173 = arith.minimumf %172, %171 : vector<16x128xf32>
    %174 = arith.mulf %115, %161 : vector<16x128xf32>
    %cst_47 = arith.constant 1.000000e+00 : f32
    %175 = vector.broadcast %cst_47 : f32 to vector<16x128xf32>
    %176 = arith.subf %175, %174 : vector<16x128xf32>
    %177 = arith.mulf %108, %176 : vector<16x128xf32>
    %cst_48 = arith.constant 0.000000e+00 : f32
    %cst_49 = arith.constant 1.000000e+00 : f32
    %178 = vector.broadcast %cst_48 : f32 to vector<16x128xf32>
    %179 = arith.maximumf %178, %177 : vector<16x128xf32>
    %180 = vector.broadcast %cst_49 : f32 to vector<16x128xf32>
    %181 = arith.minimumf %180, %179 : vector<16x128xf32>
    %cst_50 = arith.constant 1.000000e+00 : f32
    %182 = vector.broadcast %cst_50 : f32 to vector<16x128xf32>
    %183 = arith.subf %182, %161 : vector<16x128xf32>
    %184 = arith.mulf %115, %183 : vector<16x128xf32>
    %cst_51 = arith.constant 1.000000e+00 : f32
    %185 = vector.broadcast %cst_51 : f32 to vector<16x128xf32>
    %186 = arith.subf %185, %184 : vector<16x128xf32>
    %187 = arith.mulf %108, %186 : vector<16x128xf32>
    %cst_52 = arith.constant 0.000000e+00 : f32
    %cst_53 = arith.constant 1.000000e+00 : f32
    %188 = vector.broadcast %cst_52 : f32 to vector<16x128xf32>
    %189 = arith.maximumf %188, %187 : vector<16x128xf32>
    %190 = vector.broadcast %cst_53 : f32 to vector<16x128xf32>
    %191 = arith.minimumf %190, %189 : vector<16x128xf32>
    %cst_54 = arith.constant 0.000000e+00 : f32
    %192 = vector.broadcast %cst_54 : f32 to vector<16x128xf32>
    %193 = arith.cmpf oeq, %166, %192 : vector<16x128xf32>
    %194 = arith.extui %193 : vector<16x128xi1> to vector<16x128xi32>
    %195 = arith.sitofp %194 : vector<16x128xi32> to vector<16x128xf32>
    %cst_55 = arith.constant 1.000000e+00 : f32
    %196 = vector.broadcast %cst_55 : f32 to vector<16x128xf32>
    %197 = arith.cmpf oeq, %166, %196 : vector<16x128xf32>
    %198 = arith.extui %197 : vector<16x128xi1> to vector<16x128xi32>
    %199 = arith.sitofp %198 : vector<16x128xi32> to vector<16x128xf32>
    %cst_56 = arith.constant 2.000000e+00 : f32
    %200 = vector.broadcast %cst_56 : f32 to vector<16x128xf32>
    %201 = arith.cmpf oeq, %166, %200 : vector<16x128xf32>
    %202 = arith.extui %201 : vector<16x128xi1> to vector<16x128xi32>
    %203 = arith.sitofp %202 : vector<16x128xi32> to vector<16x128xf32>
    %cst_57 = arith.constant 3.000000e+00 : f32
    %204 = vector.broadcast %cst_57 : f32 to vector<16x128xf32>
    %205 = arith.cmpf oeq, %166, %204 : vector<16x128xf32>
    %206 = arith.extui %205 : vector<16x128xi1> to vector<16x128xi32>
    %207 = arith.sitofp %206 : vector<16x128xi32> to vector<16x128xf32>
    %cst_58 = arith.constant 4.000000e+00 : f32
    %208 = vector.broadcast %cst_58 : f32 to vector<16x128xf32>
    %209 = arith.cmpf oeq, %166, %208 : vector<16x128xf32>
    %210 = arith.extui %209 : vector<16x128xi1> to vector<16x128xi32>
    %211 = arith.sitofp %210 : vector<16x128xi32> to vector<16x128xf32>
    %cst_59 = arith.constant 5.000000e+00 : f32
    %212 = vector.broadcast %cst_59 : f32 to vector<16x128xf32>
    %213 = arith.cmpf oeq, %166, %212 : vector<16x128xf32>
    %214 = arith.extui %213 : vector<16x128xi1> to vector<16x128xi32>
    %215 = arith.sitofp %214 : vector<16x128xi32> to vector<16x128xf32>
    %216 = arith.mulf %195, %108 : vector<16x128xf32>
    %217 = arith.mulf %199, %181 : vector<16x128xf32>
    %218 = arith.addf %216, %217 : vector<16x128xf32>
    %219 = arith.mulf %203, %173 : vector<16x128xf32>
    %220 = arith.addf %218, %219 : vector<16x128xf32>
    %221 = arith.mulf %207, %173 : vector<16x128xf32>
    %222 = arith.addf %220, %221 : vector<16x128xf32>
    %223 = arith.mulf %211, %191 : vector<16x128xf32>
    %224 = arith.addf %222, %223 : vector<16x128xf32>
    %225 = arith.mulf %215, %108 : vector<16x128xf32>
    %226 = arith.addf %224, %225 : vector<16x128xf32>
    %227 = arith.mulf %195, %191 : vector<16x128xf32>
    %228 = arith.mulf %199, %108 : vector<16x128xf32>
    %229 = arith.addf %227, %228 : vector<16x128xf32>
    %230 = arith.mulf %203, %108 : vector<16x128xf32>
    %231 = arith.addf %229, %230 : vector<16x128xf32>
    %232 = arith.mulf %207, %181 : vector<16x128xf32>
    %233 = arith.addf %231, %232 : vector<16x128xf32>
    %234 = arith.mulf %211, %173 : vector<16x128xf32>
    %235 = arith.addf %233, %234 : vector<16x128xf32>
    %236 = arith.mulf %215, %173 : vector<16x128xf32>
    %237 = arith.addf %235, %236 : vector<16x128xf32>
    %238 = arith.mulf %195, %173 : vector<16x128xf32>
    %239 = arith.mulf %199, %173 : vector<16x128xf32>
    %240 = arith.addf %238, %239 : vector<16x128xf32>
    %241 = arith.mulf %203, %191 : vector<16x128xf32>
    %242 = arith.addf %240, %241 : vector<16x128xf32>
    %243 = arith.mulf %207, %108 : vector<16x128xf32>
    %244 = arith.addf %242, %243 : vector<16x128xf32>
    %245 = arith.mulf %211, %108 : vector<16x128xf32>
    %246 = arith.addf %244, %245 : vector<16x128xf32>
    %247 = arith.mulf %215, %181 : vector<16x128xf32>
    %248 = arith.addf %246, %247 : vector<16x128xf32>
    %cst_60 = arith.constant 1.000000e+00 : f32
    %249 = arith.subf %cst_60, %4 : f32
    %250 = vector.broadcast %4 : f32 to vector<16x128xf32>
    %251 = arith.mulf %250, %226 : vector<16x128xf32>
    %252 = vector.broadcast %249 : f32 to vector<16x128xf32>
    %253 = arith.mulf %252, %88 : vector<16x128xf32>
    %254 = arith.addf %251, %253 : vector<16x128xf32>
    %255 = vector.broadcast %4 : f32 to vector<16x128xf32>
    %256 = arith.mulf %255, %237 : vector<16x128xf32>
    %257 = vector.broadcast %249 : f32 to vector<16x128xf32>
    %258 = arith.mulf %257, %97 : vector<16x128xf32>
    %259 = arith.addf %256, %258 : vector<16x128xf32>
    %260 = vector.broadcast %4 : f32 to vector<16x128xf32>
    %261 = arith.mulf %260, %248 : vector<16x128xf32>
    %262 = vector.broadcast %249 : f32 to vector<16x128xf32>
    %263 = arith.mulf %262, %106 : vector<16x128xf32>
    %264 = arith.addf %261, %263 : vector<16x128xf32>
    %cst_61 = arith.constant 2.989000e-01 : f32
    %265 = vector.broadcast %cst_61 : f32 to vector<16x128xf32>
    %266 = arith.mulf %265, %254 : vector<16x128xf32>
    %cst_62 = arith.constant 5.870000e-01 : f32
    %267 = vector.broadcast %cst_62 : f32 to vector<16x128xf32>
    %268 = arith.mulf %267, %259 : vector<16x128xf32>
    %269 = arith.addf %266, %268 : vector<16x128xf32>
    %cst_63 = arith.constant 1.140000e-01 : f32
    %270 = vector.broadcast %cst_63 : f32 to vector<16x128xf32>
    %271 = arith.mulf %270, %264 : vector<16x128xf32>
    %272 = arith.addf %269, %271 : vector<16x128xf32>
    %273 = vector.shape_cast %272 : vector<16x128xf32> to vector<1x16x128xf32>
    %cst_64 = arith.constant dense<0.000000e+00> : vector<1xf32>
    %274 = vector.multi_reduction <add>, %273, %cst_64 [1, 2] : vector<1x16x128xf32> to vector<1xf32>
    %275 = vector.shape_cast %274 : vector<1xf32> to vector<1x1x1xf32>
    %276 = vector.extract %275[0, 0, 0] : f32 from vector<1x1x1xf32>
    %cst_65 = arith.constant 4.8828125E-4 : f32
    %277 = arith.mulf %276, %cst_65 : f32
    %cst_66 = arith.constant 1.000000e+00 : f32
    %278 = arith.subf %cst_66, %5 : f32
    %279 = vector.broadcast %5 : f32 to vector<16x128xf32>
    %280 = arith.mulf %279, %254 : vector<16x128xf32>
    %281 = arith.mulf %278, %277 : f32
    %282 = vector.broadcast %281 : f32 to vector<16x128xf32>
    %283 = arith.addf %280, %282 : vector<16x128xf32>
    %cst_67 = arith.constant 0.000000e+00 : f32
    %cst_68 = arith.constant 1.000000e+00 : f32
    %284 = vector.broadcast %cst_67 : f32 to vector<16x128xf32>
    %285 = arith.maximumf %284, %283 : vector<16x128xf32>
    %286 = vector.broadcast %cst_68 : f32 to vector<16x128xf32>
    %287 = arith.minimumf %286, %285 : vector<16x128xf32>
    %288 = vector.broadcast %5 : f32 to vector<16x128xf32>
    %289 = arith.mulf %288, %259 : vector<16x128xf32>
    %290 = arith.mulf %278, %277 : f32
    %291 = vector.broadcast %290 : f32 to vector<16x128xf32>
    %292 = arith.addf %289, %291 : vector<16x128xf32>
    %cst_69 = arith.constant 0.000000e+00 : f32
    %cst_70 = arith.constant 1.000000e+00 : f32
    %293 = vector.broadcast %cst_69 : f32 to vector<16x128xf32>
    %294 = arith.maximumf %293, %292 : vector<16x128xf32>
    %295 = vector.broadcast %cst_70 : f32 to vector<16x128xf32>
    %296 = arith.minimumf %295, %294 : vector<16x128xf32>
    %297 = vector.broadcast %5 : f32 to vector<16x128xf32>
    %298 = arith.mulf %297, %264 : vector<16x128xf32>
    %299 = arith.mulf %278, %277 : f32
    %300 = vector.broadcast %299 : f32 to vector<16x128xf32>
    %301 = arith.addf %298, %300 : vector<16x128xf32>
    %cst_71 = arith.constant 0.000000e+00 : f32
    %cst_72 = arith.constant 1.000000e+00 : f32
    %302 = vector.broadcast %cst_71 : f32 to vector<16x128xf32>
    %303 = arith.maximumf %302, %301 : vector<16x128xf32>
    %304 = vector.broadcast %cst_72 : f32 to vector<16x128xf32>
    %305 = arith.minimumf %304, %303 : vector<16x128xf32>
    %c0_73 = arith.constant 0 : index
    %306 = memref.load %arg1[%c0_73] : memref<3xi32, #tpu.memory_space<smem>>
    %c0_i32 = arith.constant 0 : i32
    %307 = arith.cmpi eq, %306, %c0_i32 : i32
    %308 = arith.extui %307 : i1 to i32
    %309 = arith.sitofp %308 : i32 to f32
    %c1_i32 = arith.constant 1 : i32
    %310 = arith.cmpi eq, %306, %c1_i32 : i32
    %311 = arith.extui %310 : i1 to i32
    %312 = arith.sitofp %311 : i32 to f32
    %cst_74 = arith.constant 1.000000e+00 : f32
    %313 = arith.subf %cst_74, %309 : f32
    %314 = arith.subf %313, %312 : f32
    %315 = vector.broadcast %309 : f32 to vector<16x128xf32>
    %316 = arith.mulf %315, %287 : vector<16x128xf32>
    %317 = vector.broadcast %312 : f32 to vector<16x128xf32>
    %318 = arith.mulf %317, %296 : vector<16x128xf32>
    %319 = arith.addf %316, %318 : vector<16x128xf32>
    %320 = vector.broadcast %314 : f32 to vector<16x128xf32>
    %321 = arith.mulf %320, %305 : vector<16x128xf32>
    %322 = arith.addf %319, %321 : vector<16x128xf32>
    %c0_75 = arith.constant 0 : index
    %c0_76 = arith.constant 0 : index
    %c0_77 = arith.constant 0 : index
    %323 = vector.load %arg3[%c0_75, %c0_76, %c0_77] : memref<3x16x128xf32, #tpu.memory_space<vmem>>, vector<1x16x128xf32>
    %324 = vector.shape_cast %323 : vector<1x16x128xf32> to vector<16x128xf32>
    %325 = vector.shape_cast %322 : vector<16x128xf32> to vector<1x16x128xf32>
    tpu.vector_store %arg3[%c0_75, %c0_76, %c0_77], %325 {strides = array<i32>} : memref<3x16x128xf32, #tpu.memory_space<vmem>>, vector<1x16x128xf32>,
    %c1_78 = arith.constant 1 : index
    %326 = memref.load %arg1[%c1_78] : memref<3xi32, #tpu.memory_space<smem>>
    %c0_i32_79 = arith.constant 0 : i32
    %327 = arith.cmpi eq, %326, %c0_i32_79 : i32
    %328 = arith.extui %327 : i1 to i32
    %329 = arith.sitofp %328 : i32 to f32
    %c1_i32_80 = arith.constant 1 : i32
    %330 = arith.cmpi eq, %326, %c1_i32_80 : i32
    %331 = arith.extui %330 : i1 to i32
    %332 = arith.sitofp %331 : i32 to f32
    %cst_81 = arith.constant 1.000000e+00 : f32
    %333 = arith.subf %cst_81, %329 : f32
    %334 = arith.subf %333, %332 : f32
    %335 = vector.broadcast %329 : f32 to vector<16x128xf32>
    %336 = arith.mulf %335, %287 : vector<16x128xf32>
    %337 = vector.broadcast %332 : f32 to vector<16x128xf32>
    %338 = arith.mulf %337, %296 : vector<16x128xf32>
    %339 = arith.addf %336, %338 : vector<16x128xf32>
    %340 = vector.broadcast %334 : f32 to vector<16x128xf32>
    %341 = arith.mulf %340, %305 : vector<16x128xf32>
    %342 = arith.addf %339, %341 : vector<16x128xf32>
    %c1_82 = arith.constant 1 : index
    %c0_83 = arith.constant 0 : index
    %c0_84 = arith.constant 0 : index
    %343 = vector.load %arg3[%c1_82, %c0_83, %c0_84] : memref<3x16x128xf32, #tpu.memory_space<vmem>>, vector<1x16x128xf32>
    %344 = vector.shape_cast %343 : vector<1x16x128xf32> to vector<16x128xf32>
    %345 = vector.shape_cast %342 : vector<16x128xf32> to vector<1x16x128xf32>
    tpu.vector_store %arg3[%c1_82, %c0_83, %c0_84], %345 {strides = array<i32>} : memref<3x16x128xf32, #tpu.memory_space<vmem>>, vector<1x16x128xf32>,
    %c2_85 = arith.constant 2 : index
    %346 = memref.load %arg1[%c2_85] : memref<3xi32, #tpu.memory_space<smem>>
    %c0_i32_86 = arith.constant 0 : i32
    %347 = arith.cmpi eq, %346, %c0_i32_86 : i32
    %348 = arith.extui %347 : i1 to i32
    %349 = arith.sitofp %348 : i32 to f32
    %c1_i32_87 = arith.constant 1 : i32
    %350 = arith.cmpi eq, %346, %c1_i32_87 : i32
    %351 = arith.extui %350 : i1 to i32
    %352 = arith.sitofp %351 : i32 to f32
    %cst_88 = arith.constant 1.000000e+00 : f32
    %353 = arith.subf %cst_88, %349 : f32
    %354 = arith.subf %353, %352 : f32
    %355 = vector.broadcast %349 : f32 to vector<16x128xf32>
    %356 = arith.mulf %355, %287 : vector<16x128xf32>
    %357 = vector.broadcast %352 : f32 to vector<16x128xf32>
    %358 = arith.mulf %357, %296 : vector<16x128xf32>
    %359 = arith.addf %356, %358 : vector<16x128xf32>
    %360 = vector.broadcast %354 : f32 to vector<16x128xf32>
    %361 = arith.mulf %360, %305 : vector<16x128xf32>
    %362 = arith.addf %359, %361 : vector<16x128xf32>
    %c2_89 = arith.constant 2 : index
    %c0_90 = arith.constant 0 : index
    %c0_91 = arith.constant 0 : index
    %363 = vector.load %arg3[%c2_89, %c0_90, %c0_91] : memref<3x16x128xf32, #tpu.memory_space<vmem>>, vector<1x16x128xf32>
    %364 = vector.shape_cast %363 : vector<1x16x128xf32> to vector<16x128xf32>
    %365 = vector.shape_cast %362 : vector<16x128xf32> to vector<1x16x128xf32>
    tpu.vector_store %arg3[%c2_89, %c0_90, %c0_91], %365 {strides = array<i32>} : memref<3x16x128xf32, #tpu.memory_space<vmem>>, vector<1x16x128xf32>,
    return
  }
}

</mosaic_0001>

<bundles_post_ra>
// kernel: tpu_custom_call.1
= control target key start
LH: loop header
LB: loop body
LE: loop exit
PB: predicated region body
PF: predicated region fallthrough
CT: control target
= control target key end

     0   :  { %8 = vsyncpa [#allocation5], 0  ;;  %s1188_s0 = inlined_call_operand.hbm [shape: f32[6], index: 0, kind: input, shape index: {}]   ;;  %s1189_s1 = inlined_call_operand.hbm [shape: s32[3], index: 1, kind: input, shape index: {}]   ;;  %s1190_s2 = inlined_call_operand.hbm [shape: f32[3,16,128], index: 2, kind: input, shape index: {}]   ;;  %s1191_s3 = inlined_call_operand.hbm [shape: f32[3,16,128], index: 3, kind: output, shape index: {}]  }
   0x1   :  { %9 = vsyncpa [#allocation7], 0 }
   0x2   :  { %10 = vsyncpa [#allocation3], 0 }
   0x3   :  { %11 = vsyncpa [#allocation4], 0  ;;  %s17_s14 = sshll.u32 %s1188_s0, 4  ;;  %s26_s17 = sshll.u32 %s1189_s1, 4  ;;  %s18_s14 = int_to_ptr.hbm [resolvable:$true] %s17_s14  ;;  %s27_s17 = int_to_ptr.hbm [resolvable:$true] %s26_s17 }
   0x4   :  { %s767_s18 = smov [#allocation2]   ;;  %s768_s19 = smov [#allocation6]  }
   0x5   :  { %20 = dma.hbm_to_smem %s18_s14, 16, %s767_s18, [#allocation5]  }
   0x6   :  { %29 = dma.hbm_to_smem %s27_s17, 16, %s768_s19, [#allocation7]  }
   0x7   :  { %s34_s22 = sshll.u32 %s1190_s2, 4  ;;  %s769_s23 = smov [#allocation8]   ;;  %s35_s22 = int_to_ptr.hbm [resolvable:$true] %s34_s22 }
   0x8   :  { %s36_s24 = sshll.u32 %s769_s23, 4  ;;  %s770_s25 = smov 128   ;;  %s37_s24 = int_to_ptr.vmem [resolvable:$true] %s36_s24 }
   0x9   :  { %s771_s0 = smov 8  }
   0xa   :  { %42 = dma.hbm_to_vmem [thread:$0]  %s35_s22, 768, %s37_s24, [#allocation3], %s770_s25, %s770_s25, %s771_s0  }
   0xb   :  { %759 = dma.done.wait [#allocation5], 16  }
   0xc   :  { %760 = vsyncadd [#allocation5], 4294967280 }
   0xd   :  { %761 = dma.done.wait [#allocation7], 16  }
   0xe   :  { %762 = vsyncadd [#allocation7], 4294967280 }
   0xf   :  { %763 = dma.done.wait [#allocation3], 768  }
  0x10   :  { %764 = vsyncadd [#allocation3], 4294966528 }
  0x11   :  { %55 = sfence }
  0x12   :  { %s56_s1 = sld [smem:[#allocation2]]  ;;  %v62_v0 = vld [vmem:[#allocation8] sm:$0xff]  ;;  %v63_v1 = vld [vmem:[#allocation8 + $0x8] sm:$0xff]  ;;  %v65_v2 = vld [vmem:[#allocation8 + $0x10] sm:$0xff] }
  0x13   :  { %v66_v3 = vld [vmem:[#allocation8 + $0x18] sm:$0xff]  ;;  %v68_v4 = vld [vmem:[#allocation8 + $0x20] sm:$0xff]  ;;  %v69_v5 = vld [vmem:[#allocation8 + $0x28] sm:$0xff]  ;;  %s638_s2 = sld [smem:[#allocation2 + $0x1]] }
  0x14   :  { %s807_s30 = sld [smem:[#allocation2 + $0x2]] }
  0x15   :  { %s640_s5 = sld [smem:[#allocation2 + $0x3]] }
  0x16   :  { %s1002_s6 = sld [smem:[#allocation2 + $0x4]] }
  0x17   :  { %s543_s8 = sld [smem:[#allocation6]] }
  0x18   :  { %v70_v6 = vstv %s56_s1  ;;  %s663_s9 = sld [smem:[#allocation6 + $0x1]] }
  0x19   :  { %v71_v7 = vmul.f32 %v70_v6, %v62_v0  ;;  %v72_v8 = vmul.f32 %v70_v6, %v63_v1  ;;  %v77_v9 = vmul.f32 %v70_v6, %v65_v2  ;;  %v78_v10 = vmul.f32 %v70_v6, %v66_v3  ;;  %s110_s26 = ssub.f32 1.0, %s638_s2 }
  0x1a   :  { %v83_v11 = vmul.f32 %v70_v6, %v68_v4  ;;  %v84_v12 = vmul.f32 %v70_v6, %v69_v5  ;;  %v111_v43 = vstv %s638_s2  ;;  %s148_s4 = ssub.f32 1.0, %s807_s30 }
  0x1b   :  { %v73_v13 = vmax.f32 %v71_v7, 0.0  ;;  %v74_v14 = vmax.f32 %v72_v8, 0.0  ;;  %v79_v15 = vmax.f32 %v77_v9, 0.0  ;;  %v80_v16 = vmax.f32 %v78_v10, 0.0  ;;  %s664_s10 = sld [smem:[#allocation6 + $0x2]] }
  0x1c   :  { %v85_v17 = vmax.f32 %v83_v11, 0.0  ;;  %v86_v18 = vmax.f32 %v84_v12, 0.0  ;;  %s473_s7 = ssub.f32 1.0, %s1002_s6 }
  0x1d   :  { %v75_v19 = vmin.f32 %v73_v13, 1.0  ;;  %v76_v20 = vmin.f32 %v74_v14, 1.0  ;;  %v81_v21 = vmin.f32 %v79_v15, 1.0  ;;  %v82_v22 = vmin.f32 %v80_v16, 1.0  ;;  %p544_p0 = scmp.eq.s32.totalorder %s543_s8, 0  ;;  %p547_p1 = scmp.eq.s32.totalorder %s543_s8, 1 }
  0x1e   :  { %v87_v23 = vmin.f32 %v85_v17, 1.0  ;;  %v88_v24 = vmin.f32 %v86_v18, 1.0  ;;  %v149_v13 = vstv %s807_s30  ;;  %v152_v14 = vstv %s148_s4  ;;  %p568_p2 = scmp.eq.s32.totalorder %s663_s9, 0  ;;  %s642_s14 = sld [smem:[#allocation2 + $0x5]] }
  0x1f   :  { %v89_v25 = vmul.f32 0.2989, %v75_v19  ;;  %v90_v26 = vmul.f32 0.2989, %v76_v20  ;;  %v91_v27 = vmul.f32 0.587, %v81_v21  ;;  %v112_v44 = vmul.f32 %v111_v43, %v75_v19 }
  0x20   :  { %v92_v28 = vmul.f32 0.587, %v82_v22  ;;  %v95_v29 = vmul.f32 0.114, %v87_v23  ;;  %v96_v30 = vmul.f32 0.114, %v88_v24  ;;  %v113_v45 = vmul.f32 %v111_v43, %v76_v20 }
  0x21   :  { %v93_v31 = vadd.f32 %v91_v27, %v89_v25  ;;  %v122_v46 = vmul.f32 %v111_v43, %v81_v21  ;;  %v123_v47 = vmul.f32 %v111_v43, %v82_v22  ;;  %v130_v48 = vmul.f32 %v111_v43, %v87_v23  ;;  %s1141_s11 = scalar_select %p544_p0, 1, 0 }
  0x22   :  { %v94_v32 = vadd.f32 %v92_v28, %v90_v26  ;;  %v131_v49 = vmul.f32 %v111_v43, %v88_v24  ;;  %s1143_s12 = scalar_select %p547_p1, 1, 0 }
  0x23   :  { %v97_v33 = vadd.f32 %v95_v29, %v93_v31  ;;  %s546_s13 = scvt.s32.f32 %s1141_s11  ;;  %p593_p3 = scmp.eq.s32.totalorder %s664_s10, 0 }
  0x24   :  { %v98_v34 = vadd.f32 %v96_v30, %v94_v32  ;;  %p571_p4 = scmp.eq.s32.totalorder %s663_s9, 1  ;;  %s549_s16 = scvt.s32.f32 %s1143_s12 }
  0x25   :  { %s1146_s15 = scalar_select %p568_p2, 1, 0 }
  0x26   :  { %v99_v35 = vadd.f32 %v98_v34, %v97_v33  ;;  %s550_s17 = ssub.f32 1.0, %s546_s13  ;;  %p596_p5 = scmp.eq.s32.totalorder %s664_s10, 1 }
  0x27   :  { %s1151_s18 = scalar_select %p593_p3, 1, 0 }
  0x28   :  { %100 = vadd.xlane.f32.xlu0 %v99_v35  ;;  %s515_s19 = ssub.f32 1.0, %s642_s14  ;;  %s570_s20 = scvt.s32.f32 %s1146_s15 }
  0x29   :  { %s1154_s21 = scalar_select %p571_p4, 1, 0 }
  0x2a   :  { %s1156_s22 = ssub.f32 %s550_s17, %s549_s16  ;;  %s595_s23 = scvt.s32.f32 %s1151_s18 }
  0x2b   :  { %s1159_s24 = scalar_select %p596_p5, 1, 0 }
  0x2c   :  { %s574_s2 = ssub.f32 1.0, %s570_s20  ;;  %s623_s10 = sshll.u32 %s1191_s3, 4  ;;  %s624_s10 = int_to_ptr.hbm [resolvable:$true] %s623_s10 }
  0x2d   :  { %s598_s30 = scvt.s32.f32 %s1159_s24 }
  0x9b   :  { %v101_v36 = vpop.xlane.xlu0 %100 }
  0x9c   :  { %v102_v37 = vrot.slane %v101_v36, 4 }
  0x9e   :  { %v103_v38 = vadd.f32 %v102_v37, %v101_v36 }
  0xa0   :  { %v104_v39 = vrot.slane %v103_v38, 2 }
  0xa2   :  { %v105_v40 = vadd.f32 %v104_v39, %v103_v38 }
  0xa4   :  { %v106_v41 = vrot.slane %v105_v40, 1 }
  0xa6   :  { %v107_v42 = vadd.f32 %v106_v41, %v105_v40 }
  0xa8   :  { %665 = vpush %v107_v42 }
  0xd9   :  { %s666_s27 = spop %665 }
  0xda   :  { %s109_s28 = smul.f32 0.00048828125, %s666_s27  ;;  %s573_s27 = scvt.s32.f32 %s1154_s21 }
  0xdc   :  { %s114_s29 = smul.f32 %s110_s26, %s109_s28  ;;  %s599_s28 = ssub.f32 1.0, %s595_s23 }
  0xdd   :  { %s1170_s4 = ssub.f32 %s574_s2, %s573_s27 }
  0xde   :  { %v115_v50 = vstv %s114_s29 }
  0xdf   :  { %v116_v51 = vadd.f32 %v115_v50, %v112_v44  ;;  %v117_v52 = vadd.f32 %v115_v50, %v113_v45  ;;  %v124_v53 = vadd.f32 %v122_v46, %v115_v50  ;;  %v125_v54 = vadd.f32 %v123_v47, %v115_v50 }
  0xe0   :  { %v132_v55 = vadd.f32 %v130_v48, %v115_v50  ;;  %v133_v56 = vadd.f32 %v131_v49, %v115_v50 }
  0xe1   :  { %v118_v57 = vmax.f32 %v116_v51, 0.0  ;;  %v119_v58 = vmax.f32 %v117_v52, 0.0  ;;  %v126_v59 = vmax.f32 %v124_v53, 0.0  ;;  %v127_v60 = vmax.f32 %v125_v54, 0.0 }
  0xe2   :  { %v134_v61 = vmax.f32 %v132_v55, 0.0  ;;  %v135_v62 = vmax.f32 %v133_v56, 0.0 }
  0xe3   :  { %v120_v63 = vmin.f32 %v118_v57, 1.0  ;;  %v121_v0 = vmin.f32 %v119_v58, 1.0  ;;  %v128_v1 = vmin.f32 %v126_v59, 1.0  ;;  %v129_v2 = vmin.f32 %v127_v60, 1.0 }
  0xe4   :  { %v136_v3 = vmin.f32 %v134_v61, 1.0  ;;  %v137_v4 = vmin.f32 %v135_v62, 1.0 }
  0xe5   :  { %v138_v5 = vmul.f32 0.2989, %v120_v63  ;;  %v139_v6 = vmul.f32 0.2989, %v121_v0  ;;  %v140_v7 = vmul.f32 0.587, %v128_v1  ;;  %v150_v17 = vmul.f32 %v149_v13, %v120_v63 }
  0xe6   :  { %v141_v8 = vmul.f32 0.587, %v129_v2  ;;  %v144_v10 = vmul.f32 0.114, %v136_v3  ;;  %v145_v12 = vmul.f32 0.114, %v137_v4  ;;  %v161_v19 = vmul.f32 %v149_v13, %v128_v1 }
  0xe7   :  { %v142_v9 = vadd.f32 %v140_v7, %v138_v5  ;;  %v169_v20 = vmul.f32 %v149_v13, %v136_v3  ;;  %v151_v21 = vmul.f32 %v149_v13, %v121_v0  ;;  %v162_v23 = vmul.f32 %v149_v13, %v129_v2 }
  0xe8   :  { %v143_v11 = vadd.f32 %v141_v8, %v139_v6  ;;  %v170_v24 = vmul.f32 %v149_v13, %v137_v4 }
  0xe9   :  { %v146_v15 = vadd.f32 %v144_v10, %v142_v9 }
  0xea   :  { %v147_v16 = vadd.f32 %v145_v12, %v143_v11 }
  0xeb   :  { %v153_v18 = vmul.f32 %v152_v14, %v146_v15 }
  0xec   :  { %v154_v22 = vmul.f32 %v152_v14, %v147_v16 }
  0xed   :  { %v155_v25 = vadd.f32 %v153_v18, %v150_v17  ;;  %v163_v26 = vadd.f32 %v161_v19, %v153_v18  ;;  %v171_v27 = vadd.f32 %v169_v20, %v153_v18  ;;  %v772_v20 = vmov 6.0  }
  0xee   :  { %v156_v28 = vadd.f32 %v154_v22, %v151_v21  ;;  %v164_v29 = vadd.f32 %v162_v23, %v154_v22  ;;  %v172_v30 = vadd.f32 %v170_v24, %v154_v22 }
  0xef   :  { %v157_v31 = vmax.f32 %v155_v25, 0.0  ;;  %v165_v32 = vmax.f32 %v163_v26, 0.0  ;;  %v173_v33 = vmax.f32 %v171_v27, 0.0 }
  0xf0   :  { %v158_v34 = vmax.f32 %v156_v28, 0.0  ;;  %v166_v35 = vmax.f32 %v164_v29, 0.0  ;;  %v174_v36 = vmax.f32 %v172_v30, 0.0 }
  0xf1   :  { %v811_v37 = vmin.f32 %v157_v31, 1.0  ;;  %v813_v38 = vmin.f32 %v165_v32, 1.0  ;;  %v819_v41 = vmin.f32 %v173_v33, 1.0 }
  0xf2   :  { %v815_v39 = vmin.f32 %v158_v34, 1.0  ;;  %v817_v40 = vmin.f32 %v166_v35, 1.0  ;;  %v825_v44 = vmin.f32 %v174_v36, 1.0  ;;  %v773_v34 = vmov 0.0  }
  0xf3   :  { %v177_v42 = vmax.f32 %v811_v37, %v813_v38  ;;  %v181_v43 = vmin.f32 %v811_v37, %v813_v38 }
  0xf4   :  { %v178_v45 = vmax.f32 %v815_v39, %v817_v40  ;;  %v182_v46 = vmin.f32 %v815_v39, %v817_v40 }
  0xf5   :  { %v832_v47 = vmax.f32 %v177_v42, %v819_v41  ;;  %v183_v48 = vmin.f32 %v181_v43, %v819_v41 }
  0xf6   :  { %v836_v49 = vmax.f32 %v178_v45, %v825_v44  ;;  %v184_v50 = vmin.f32 %v182_v46, %v825_v44 }
  0xf7   :  { %vm185_vm0 = vcmp.eq.f32.partialorder %v832_v47, %v183_v48  ;;  %v841_v51 = vsub.f32 %v832_v47, %v183_v48  ;;  %v223_v58 = vsub.f32 %v832_v47, %v811_v37  ;;  %v255_v63 = vsub.f32 %v832_v47, %v813_v38 }
  0xf8   :  { %vm186_vm1 = vcmp.eq.f32.partialorder %v836_v49, %v184_v50  ;;  %v845_v52 = vsub.f32 %v836_v49, %v184_v50  ;;  %v848_v53 = vsel %vm185_vm0, 1.0, %v832_v47  ;;  %v224_v62 = vsub.f32 %v836_v49, %v815_v39 }
  0xf9   :  { %v851_v54 = vsel %vm186_vm1, 1.0, %v836_v49  ;;  %677 = vrcp.f32 %v848_v53  ;;  %v221_v55 = vsel %vm185_vm0, 1.0, %v841_v51  ;;  %v200_v61 = vand.u32 2147483647, %v848_v53 }
  0xfa   :  { %679 = vrcp.f32 %v851_v54  ;;  %v222_v56 = vsel %vm186_vm1, 1.0, %v845_v52  ;;  %v202_v0 = vand.u32 2147483648, %v848_v53  ;;  %vm230_vm2 = vweird.f32 %v221_v55 }
  0xfb   :  { %681 = vrcp.f32 %v221_v55  ;;  %v234_v2 = vand.u32 2147483647, %v221_v55  ;;  %v236_v4 = vand.u32 2147483648, %v221_v55  ;;  %vm245_vm3 = vweird.f32 %v222_v56 }
  0xfc   :  { %683 = vrcp.f32 %v222_v56  ;;  %v249_v5 = vand.u32 2147483647, %v222_v56  ;;  %v251_v6 = vand.u32 2147483648, %v222_v56  ;;  %v256_v10 = vsub.f32 %v836_v49, %v817_v40 }
  0xfd   :  { %vm269_vm4 = vcmp.eq.f32.partialorder %v832_v47, %v813_v38  ;;  %vm270_vm5 = vcmp.eq.f32.partialorder %v836_v49, %v817_v40  ;;  %vm271_vm6 = vcmp.ne.f32.partialorder %v832_v47, %v811_v37  ;;  %vm881_vm7 = vcmp.eq.f32.partialorder %v234_v2, 8.507059e+37 }
  0xfe   :  { %vm272_vm8 = vcmp.ne.f32.partialorder %v836_v49, %v815_v39  ;;  %vm279_vm9 = vcmp.ne.f32.partialorder %v832_v47, %v813_v38  ;;  %vm263_vm10 = vcmp.eq.f32.partialorder %v832_v47, %v811_v37  ;;  %vm894_vm11 = vmand %vm269_vm4, %vm271_vm6  ;;  %vm280_vm12 = vcmp.ne.f32.partialorder %v836_v49, %v817_v40 }
  0xff   :  { %v857_v57 = vpop.eup %677  ;;  %vm904_vm14 = vmand %vm270_vm5, %vm272_vm8  ;;  %685 = vrcp.f32 %v772_v20  ;;  %v237_v25 = vor.u32 1.1754944e-38, %v236_v4  ;;  %v259_v26 = vsub.f32 %v832_v47, %v819_v41  ;;  %v260_v27 = vsub.f32 %v836_v49, %v825_v44 }
 0x100   :  { %v861_v59 = vpop.eup %679  ;;  %v192_v60 = vmul.f32 %v857_v57, %v848_v53  ;;  %vm917_vm1 = vmand %vm279_vm9, %vm271_vm6  ;;  %vm197_vm5 = vweird.f32 %v857_v57  ;;  %vm938_vm9 = vcmp.eq.f32.partialorder %v249_v5, 8.507059e+37  ;;  %v252_v31 = vor.u32 1.1754944e-38, %v251_v6 }
 0x101   :  { %v207_v1 = vmul.f32 %v861_v59, %v851_v54  ;;  %v682_v3 = vpop.eup %681  ;;  %vm931_vm4 = vmand %vm280_vm12, %vm272_vm8  ;;  %vm212_vm0 = vweird.f32 %v861_v59  ;;  %v643_v35 = vsel %vm263_vm10, 1.0, %v773_v34  ;;  %vm196_vm12 = vweird.f32 %v848_v53 }
 0x102   :  { %v684_v7 = vpop.eup %683  ;;  %v193_v8 = vsub.f32 1.0, %v192_v60  ;;  %v226_v9 = vmul.f32 %v682_v3, %v221_v55  ;;  %vm231_vm13 = vweird.f32 %v682_v3  ;;  %v645_v46 = vsel %vm894_vm11, 1.0, %v773_v34 }
 0x103   :  { %v208_v11 = vsub.f32 1.0, %v207_v1  ;;  %v241_v12 = vmul.f32 %v684_v7, %v222_v56  ;;  %vm246_vm15 = vweird.f32 %v684_v7  ;;  %vm232_vm6 = vmor %vm230_vm2, %vm231_vm13  ;;  %vm1204_vm2 = vcmp.eq.f32.partialorder %v836_v49, %v815_v39 }
 0x104   :  { %v227_v13 = vsub.f32 1.0, %v226_v9  ;;  %v194_v17 = vmul.f32 %v857_v57, %v193_v8  ;;  %vm247_vm8 = vmor %vm245_vm3, %vm246_vm15  ;;  %v644_v36 = vsel %vm1204_vm2, 1.0, %v773_v34  ;;  %v646_v5 = vsel %vm904_vm14, 1.0, %v773_v34 }
 0x105   :  { %v242_v15 = vsub.f32 1.0, %v241_v12  ;;  %v209_v21 = vmul.f32 %v861_v59, %v208_v11  ;;  %v686_v48 = vpop.eup %685  ;;  %vm211_vm10 = vweird.f32 %v851_v54  ;;  %vm201_vm13 = vcmp.eq.f32.partialorder %v200_v61, 8.507059e+37 }
 0x106   :  { %v228_v18 = vmul.f32 %v682_v3, %v227_v13  ;;  %v195_v32 = vadd.f32 %v857_v57, %v194_v17  ;;  %v308_v4 = vmul.f32 6.0, %v686_v48  ;;  %vm312_vm3 = vweird.f32 %v686_v48  ;;  %vm213_vm11 = vmor %vm211_vm10, %vm212_vm0 }
 0x107   :  { %v243_v22 = vmul.f32 %v684_v7, %v242_v15  ;;  %v210_v42 = vadd.f32 %v861_v59, %v209_v21  ;;  %v217_v21 = vand.u32 2147483648, %v851_v54  ;;  %v322_v53 = vstv %s640_s5  ;;  %s1174_s5 = ssub.f32 %s599_s28, %s598_s30 }
 0x108   :  { %v229_v24 = vadd.f32 %v682_v3, %v228_v18  ;;  %v309_v12 = vsub.f32 1.0, %v308_v4  ;;  %v648_v18 = vsel %vm931_vm4, 1.0, %v773_v34 }
 0x109   :  { %v244_v29 = vadd.f32 %v684_v7, %v243_v22 }
 0x10a   :  { %v233_v33 = vsel %vm232_vm6, %v682_v3, %v229_v24  ;;  %v310_v17 = vmul.f32 %v686_v48, %v309_v12 }
 0x10b   :  { %v238_v43 = vsel %vm881_vm7, %v237_v25, %v233_v33  ;;  %v248_v45 = vsel %vm247_vm8, %v684_v7, %v244_v29  ;;  %vm986_vm7 = vmor %vm196_vm12, %vm197_vm5  ;;  %v214_v33 = vsel %vm213_vm11, %v861_v59, %v210_v42 }
 0x10c   :  { %v239_v50 = vmul.f32 %v238_v43, %v223_v58  ;;  %v253_v55 = vsel %vm938_vm9, %v252_v31, %v248_v45  ;;  %v257_v56 = vmul.f32 %v255_v63, %v238_v43  ;;  %v261_v60 = vmul.f32 %v259_v26, %v238_v43 }
 0x10d   :  { %v254_v1 = vmul.f32 %v253_v55, %v224_v62  ;;  %v258_v2 = vmul.f32 %v256_v10, %v253_v55  ;;  %v262_v3 = vmul.f32 %v260_v27, %v253_v55  ;;  %v647_v63 = vsel %vm917_vm1, 1.0, %v773_v34 }
 0x10e   :  { %v287_v58 = vsub.f32 %v261_v60, %v257_v56  ;;  %v291_v6 = vadd.f32 2.0, %v239_v50  ;;  %v299_v7 = vadd.f32 4.0, %v257_v56  ;;  %v311_v23 = vadd.f32 %v686_v48, %v310_v17 }
 0x10f   :  { %v288_v8 = vsub.f32 %v262_v3, %v258_v2  ;;  %v292_v9 = vadd.f32 2.0, %v254_v1  ;;  %v300_v11 = vadd.f32 4.0, %v258_v2  ;;  %v215_v26 = vand.u32 2147483647, %v851_v54 }
 0x110   :  { %v289_v13 = vmul.f32 %v643_v35, %v287_v58  ;;  %v293_v62 = vsub.f32 %v291_v6, %v261_v60  ;;  %v301_v10 = vsub.f32 %v299_v7, %v239_v50  ;;  %v199_v28 = vsel %vm986_vm7, %v857_v57, %v195_v32 }
 0x111   :  { %v290_v14 = vmul.f32 %v644_v36, %v288_v8  ;;  %v294_v15 = vsub.f32 %v292_v9, %v262_v3  ;;  %v302_v16 = vsub.f32 %v300_v11, %v254_v1  ;;  %v313_v30 = vsel %vm312_vm3, %v686_v48, %v311_v23 }
 0x112   :  { %v295_v19 = vmul.f32 %v645_v46, %v293_v62  ;;  %v303_v20 = vmul.f32 %v647_v63, %v301_v10  ;;  %v203_v31 = vor.u32 1.1754944e-38, %v202_v0  ;;  %v218_v54 = vor.u32 1.1754944e-38, %v217_v21 }
 0x113   :  { %v296_v22 = vmul.f32 %v646_v5, %v294_v15  ;;  %v304_v24 = vmul.f32 %v648_v18, %v302_v16  ;;  %vm216_vm14 = vcmp.eq.f32.partialorder %v215_v26, 8.507059e+37 }
 0x114   :  { %v297_v27 = vadd.f32 %v295_v19, %v289_v13  ;;  %v204_v43 = vsel %vm201_vm13, %v203_v31, %v199_v28  ;;  %v219_v57 = vsel %vm216_vm14, %v218_v54, %v214_v33 }
 0x115   :  { %v298_v29 = vadd.f32 %v296_v22, %v290_v14  ;;  %v205_v48 = vmul.f32 %v204_v43, %v841_v51  ;;  %v220_v59 = vmul.f32 %v219_v57, %v845_v52  ;;  %v1009_v52 = vstv %s473_s7 }
 0x116   :  { %v305_v35 = vadd.f32 %v303_v20, %v297_v27  ;;  %v1013_v13 = vmul.f32 %v1009_v52, %v811_v37  ;;  %v1017_v62 = vmul.f32 %v1009_v52, %v815_v39  ;;  %v1021_v10 = vmul.f32 %v1009_v52, %v813_v38 }
 0x117   :  { %v306_v36 = vadd.f32 %v304_v24, %v298_v29  ;;  %v341_v56 = vsub.f32 1.0, %v205_v48  ;;  %v342_v1 = vsub.f32 1.0, %v220_v59  ;;  %v1025_v16 = vmul.f32 %v1009_v52, %v817_v40 }
 0x118   :  { %v314_v45 = vmul.f32 %v313_v30, %v305_v35 }
 0x119   :  { %v315_v32 = vmul.f32 %v313_v30, %v306_v36  ;;  %v343_v5 = vmul.f32 %v341_v56, %v832_v47  ;;  %v344_v51 = vmul.f32 %v342_v1, %v836_v49 }
 0x11a   :  { %v316_v46 = vadd.f32 1.0, %v314_v45 }
 0x11b   :  { %v317_v0 = vadd.f32 1.0, %v315_v32  ;;  %v345_v9 = vmax.f32 %v343_v5, 0.0  ;;  %v346_v12 = vmax.f32 %v344_v51, 0.0 }
 0x11c   :  { %v318_v42 = vfloor.f32 %v316_v46 }
 0x11d   :  { %v319_v50 = vfloor.f32 %v317_v0  ;;  %v1027_v37 = vmin.f32 %v345_v9, 1.0  ;;  %v1029_v20 = vmin.f32 %v346_v12, 1.0 }
 0x11e   :  { %v320_v61 = vsub.f32 %v316_v46, %v318_v42 }
 0x11f   :  { %v321_v55 = vsub.f32 %v317_v0, %v319_v50 }
 0x120   :  { %v323_v60 = vadd.f32 %v322_v53, %v320_v61 }
 0x121   :  { %v324_v2 = vadd.f32 %v322_v53, %v321_v55 }
 0x122   :  { %v325_v3 = vfloor.f32 %v323_v60 }
 0x123   :  { %v326_v4 = vfloor.f32 %v324_v2 }
 0x124   :  { %v327_v58 = vsub.f32 %v323_v60, %v325_v3 }
 0x125   :  { %v328_v6 = vsub.f32 %v324_v2, %v326_v4 }
 0x126   :  { %v329_v7 = vmul.f32 6.0, %v327_v58 }
 0x127   :  { %v330_v8 = vmul.f32 6.0, %v328_v6 }
 0x128   :  { %v331_v11 = vfloor.f32 %v329_v7 }
 0x129   :  { %v332_v63 = vfloor.f32 %v330_v8 }
 0x12a   :  { %v333_v14 = vsub.f32 %v329_v7, %v331_v11  ;;  %vm335_vm15 = vcmp.ge.f32.partialorder %v331_v11, 6.0  ;;  %v649_v15 = vadd.f32 -6.0, %v331_v11 }
 0x12b   :  { %v334_v17 = vsub.f32 %v330_v8, %v332_v63  ;;  %vm336_vm0 = vcmp.ge.f32.partialorder %v332_v63, 6.0  ;;  %v650_v18 = vadd.f32 -6.0, %v332_v63 }
 0x12c   :  { %v339_v19 = vsel %vm335_vm15, %v649_v15, %v331_v11  ;;  %v349_v39 = vmul.f32 %v333_v14, %v205_v48  ;;  %v359_v21 = vsub.f32 1.0, %v333_v14 }
 0x12d   :  { %v340_v22 = vsel %vm336_vm0, %v650_v18, %v332_v63  ;;  %v350_v38 = vmul.f32 %v334_v17, %v220_v59  ;;  %v360_v24 = vsub.f32 1.0, %v334_v17  ;;  %vm371_vm1 = vcmp.eq.f32.partialorder %v339_v19, 0.0 }
 0x12e   :  { %v351_v23 = vsub.f32 1.0, %v349_v39  ;;  %v361_v25 = vmul.f32 %v359_v21, %v205_v48  ;;  %vm372_vm4 = vcmp.eq.f32.partialorder %v340_v22, 0.0  ;;  %v1032_v40 = vsel %vm371_vm1, 1.0, %v773_v34 }
 0x12f   :  { %v352_v26 = vsub.f32 1.0, %v350_v38  ;;  %v362_v27 = vmul.f32 %v360_v24, %v220_v59  ;;  %v1035_v28 = vsel %vm372_vm4, 1.0, %v773_v34  ;;  %vm377_vm5 = vcmp.eq.f32.partialorder %v339_v19, 1.0 }
 0x130   :  { %v353_v29 = vmul.f32 %v351_v23, %v832_v47  ;;  %v363_v30 = vsub.f32 1.0, %v361_v25  ;;  %vm378_vm6 = vcmp.eq.f32.partialorder %v340_v22, 1.0  ;;  %v1039_v31 = vsel %vm377_vm5, 1.0, %v773_v34 }
 0x131   :  { %v354_v33 = vmul.f32 %v352_v26, %v836_v49  ;;  %v364_v35 = vsub.f32 1.0, %v362_v27  ;;  %v1043_v54 = vsel %vm378_vm6, 1.0, %v773_v34  ;;  %vm383_vm9 = vcmp.eq.f32.partialorder %v339_v19, 2.0 }
 0x132   :  { %v355_v36 = vmax.f32 %v353_v29, 0.0  ;;  %v365_v43 = vmul.f32 %v363_v30, %v832_v47  ;;  %vm384_vm8 = vcmp.eq.f32.partialorder %v340_v22, 2.0  ;;  %v1047_v45 = vsel %vm383_vm9, 1.0, %v773_v34 }
 0x133   :  { %v356_v57 = vmax.f32 %v354_v33, 0.0  ;;  %v366_v32 = vmul.f32 %v364_v35, %v836_v49  ;;  %v1051_v46 = vsel %vm384_vm8, 1.0, %v773_v34  ;;  %vm389_vm2 = vcmp.eq.f32.partialorder %v339_v19, 3.0 }
 0x134   :  { %v1053_v48 = vmin.f32 %v355_v36, 1.0  ;;  %v367_v0 = vmax.f32 %v365_v43, 0.0  ;;  %vm390_vm12 = vcmp.eq.f32.partialorder %v340_v22, 3.0  ;;  %v1056_v59 = vsel %vm389_vm2, 1.0, %v773_v34 }
 0x135   :  { %v1058_v42 = vmin.f32 %v356_v57, 1.0  ;;  %v368_v50 = vmax.f32 %v366_v32, 0.0  ;;  %v1061_v53 = vsel %vm390_vm12, 1.0, %v773_v34  ;;  %vm395_vm3 = vcmp.eq.f32.partialorder %v339_v19, 4.0 }
 0x136   :  { %v369_v61 = vmin.f32 %v367_v0, 1.0  ;;  %vm396_vm7 = vcmp.eq.f32.partialorder %v340_v22, 4.0  ;;  %v659_v55 = vsel %vm395_vm3, 1.0, %v773_v34  ;;  %vm401_vm10 = vcmp.eq.f32.partialorder %v339_v19, 5.0 }
 0x137   :  { %v370_v56 = vmin.f32 %v368_v50, 1.0  ;;  %v1065_v60 = vsel %vm396_vm7, 1.0, %v773_v34  ;;  %vm402_vm11 = vcmp.eq.f32.partialorder %v340_v22, 5.0  ;;  %v661_v1 = vsel %vm401_vm10, 1.0, %v773_v34 }
 0x138   :  { %v662_v2 = vsel %vm402_vm11, 1.0, %v773_v34  ;;  %v407_v3 = vmul.f32 %v1032_v40, %v832_v47  ;;  %v408_v4 = vmul.f32 %v1035_v28, %v836_v49  ;;  %v409_v5 = vmul.f32 %v1039_v31, %v1053_v48 }
 0x139   :  { %v410_v58 = vmul.f32 %v1043_v54, %v1058_v42  ;;  %v413_v51 = vmul.f32 %v1047_v45, %v1027_v37  ;;  %v414_v6 = vmul.f32 %v1051_v46, %v1029_v20  ;;  %v417_v34 = vmul.f32 %v1056_v59, %v1027_v37 }
 0x13a   :  { %v411_v7 = vadd.f32 %v409_v5, %v407_v3  ;;  %v418_v8 = vmul.f32 %v1061_v53, %v1029_v20  ;;  %v421_v9 = vmul.f32 %v659_v55, %v369_v61  ;;  %v422_v11 = vmul.f32 %v1065_v60, %v370_v56 }
 0x13b   :  { %v412_v12 = vadd.f32 %v410_v58, %v408_v4  ;;  %v425_v63 = vmul.f32 %v661_v1, %v832_v47  ;;  %v426_v14 = vmul.f32 %v662_v2, %v836_v49  ;;  %v429_v15 = vmul.f32 %v1032_v40, %v369_v61 }
 0x13c   :  { %v415_v17 = vadd.f32 %v413_v51, %v411_v7  ;;  %v430_v18 = vmul.f32 %v1035_v28, %v370_v56  ;;  %v431_v19 = vmul.f32 %v1039_v31, %v832_v47  ;;  %v432_v39 = vmul.f32 %v1043_v54, %v836_v49 }
 0x13d   :  { %v416_v21 = vadd.f32 %v414_v6, %v412_v12  ;;  %v435_v22 = vmul.f32 %v1047_v45, %v832_v47  ;;  %v436_v38 = vmul.f32 %v1051_v46, %v836_v49  ;;  %v439_v24 = vmul.f32 %v1056_v59, %v1053_v48 }
 0x13e   :  { %v419_v23 = vadd.f32 %v417_v34, %v415_v17  ;;  %v433_v25 = vadd.f32 %v431_v19, %v429_v15  ;;  %v434_v26 = vadd.f32 %v432_v39, %v430_v18  ;;  %v440_v27 = vmul.f32 %v1061_v53, %v1058_v42 }
 0x13f   :  { %v420_v29 = vadd.f32 %v418_v8, %v416_v21  ;;  %v443_v30 = vmul.f32 %v659_v55, %v1027_v37  ;;  %v444_v33 = vmul.f32 %v1065_v60, %v1029_v20  ;;  %v447_v35 = vmul.f32 %v661_v1, %v1027_v37 }
 0x140   :  { %v423_v36 = vadd.f32 %v421_v9, %v419_v23  ;;  %v437_v43 = vadd.f32 %v435_v22, %v433_v25  ;;  %v438_v57 = vadd.f32 %v436_v38, %v434_v26  ;;  %v448_v32 = vmul.f32 %v662_v2, %v1029_v20 }
 0x141   :  { %v424_v0 = vadd.f32 %v422_v11, %v420_v29  ;;  %v451_v50 = vmul.f32 %v1032_v40, %v1027_v37  ;;  %v452_v3 = vmul.f32 %v1035_v28, %v1029_v20  ;;  %v453_v4 = vmul.f32 %v1039_v31, %v1027_v37 }
 0x142   :  { %v427_v5 = vadd.f32 %v425_v63, %v423_v36  ;;  %v441_v58 = vadd.f32 %v439_v24, %v437_v43  ;;  %v442_v51 = vadd.f32 %v440_v27, %v438_v57  ;;  %v454_v6 = vmul.f32 %v1043_v54, %v1029_v20 }
 0x143   :  { %v428_v34 = vadd.f32 %v426_v14, %v424_v0  ;;  %v455_v7 = vadd.f32 %v453_v4, %v451_v50  ;;  %v457_v8 = vmul.f32 %v1047_v45, %v369_v61  ;;  %v458_v9 = vmul.f32 %v1051_v46, %v370_v56 }
 0x144   :  { %v445_v11 = vadd.f32 %v443_v30, %v441_v58  ;;  %v446_v40 = vadd.f32 %v444_v33, %v442_v51  ;;  %v456_v12 = vadd.f32 %v454_v6, %v452_v3  ;;  %v474_v15 = vstv %s1002_s6  ;;  %s774_s6 = smov [#allocation9]  }
 0x145   :  { %v459_v28 = vadd.f32 %v457_v8, %v455_v7  ;;  %v461_v37 = vmul.f32 %v1056_v59, %v832_v47  ;;  %v462_v31 = vmul.f32 %v1061_v53, %v836_v49  ;;  %v465_v63 = vmul.f32 %v659_v55, %v832_v47  ;;  %s621_s7 = sshll.u32 %s774_s6, 4  ;;  %s622_s7 = int_to_ptr.vmem [resolvable:$true] %s621_s7 }
 0x146   :  { %v449_v20 = vadd.f32 %v447_v35, %v445_v11  ;;  %v450_v54 = vadd.f32 %v448_v32, %v446_v40  ;;  %v460_v14 = vadd.f32 %v458_v9, %v456_v12  ;;  %v469_v45 = vmul.f32 %v661_v1, %v1053_v48 }
 0x147   :  { %v463_v61 = vadd.f32 %v461_v37, %v459_v28  ;;  %v470_v46 = vmul.f32 %v662_v2, %v1058_v42  ;;  %v475_v56 = vmul.f32 %v474_v15, %v427_v5  ;;  %v476_v17 = vmul.f32 %v474_v15, %v428_v34 }
 0x148   :  { %v464_v18 = vadd.f32 %v462_v31, %v460_v14  ;;  %v466_v19 = vmul.f32 %v1065_v60, %v836_v49  ;;  %v482_v59 = vmul.f32 %v474_v15, %v449_v20  ;;  %v483_v39 = vmul.f32 %v474_v15, %v450_v54 }
 0x149   :  { %v467_v21 = vadd.f32 %v465_v63, %v463_v61  ;;  %v480_v53 = vadd.f32 %v1013_v13, %v475_v56  ;;  %v481_v47 = vadd.f32 %v1017_v62, %v476_v17  ;;  %v490_v13 = vmul.f32 %v1009_v52, %v819_v41 }
 0x14a   :  { %v468_v55 = vadd.f32 %v466_v19, %v464_v18  ;;  %v1130_v22 = vadd.f32 %v1021_v10, %v482_v59  ;;  %v1133_v48 = vadd.f32 %v1025_v16, %v483_v39  ;;  %v491_v10 = vmul.f32 %v1009_v52, %v825_v44 }
 0x14b   :  { %v471_v42 = vadd.f32 %v469_v45, %v467_v21  ;;  %v494_v1 = vmul.f32 0.2989, %v480_v53  ;;  %v495_v38 = vmul.f32 0.2989, %v481_v47  ;;  %v516_v44 = vstv %s642_s14 }
 0x14c   :  { %v472_v2 = vadd.f32 %v470_v46, %v468_v55  ;;  %v496_v49 = vmul.f32 0.587, %v1130_v22  ;;  %v497_v60 = vmul.f32 0.587, %v1133_v48  ;;  %v517_v52 = vmul.f32 %v516_v44, %v480_v53 }
 0x14d   :  { %v488_v24 = vmul.f32 %v474_v15, %v471_v42  ;;  %v518_v3 = vmul.f32 %v516_v44, %v481_v47  ;;  %v527_v4 = vmul.f32 %v516_v44, %v1130_v22  ;;  %v528_v5 = vmul.f32 %v516_v44, %v1133_v48 }
 0x14e   :  { %v489_v62 = vmul.f32 %v474_v15, %v472_v2  ;;  %v498_v23 = vadd.f32 %v496_v49, %v494_v1  ;;  %v499_v25 = vadd.f32 %v497_v60, %v495_v38  ;;  %v552_v34 = vstv %s546_s13 }
 0x14f   :  { %v492_v16 = vadd.f32 %v490_v13, %v488_v24  ;;  %v555_v7 = vstv %s549_s16  ;;  %v560_v8 = vstv %s1156_s22  ;;  %v576_v37 = vstv %s570_s20 }
 0x150   :  { %v493_v26 = vadd.f32 %v491_v10, %v489_v62  ;;  %v579_v31 = vstv %s573_s27  ;;  %v584_v46 = vstv %s1170_s4  ;;  %v601_v56 = vstv %s595_s23 }
 0x151   :  { %v500_v27 = vmul.f32 0.114, %v492_v16  ;;  %v535_v58 = vmul.f32 %v516_v44, %v492_v16  ;;  %v604_v53 = vstv %s598_s30  ;;  %v609_v47 = vstv %s1174_s5 }
 0x152   :  { %v501_v29 = vmul.f32 0.114, %v493_v26  ;;  %v536_v51 = vmul.f32 %v516_v44, %v493_v26 }
 0x153   :  { %v502_v30 = vadd.f32 %v500_v27, %v498_v23 }
 0x154   :  { %v503_v33 = vadd.f32 %v501_v29, %v499_v25 }
 0x156   :  { %v504_v35 = vadd.f32 %v503_v33, %v502_v30 }
 0x158   :  { %505 = vadd.xlane.f32.xlu0 %v504_v35 }
 0x1cb   :  { %v506_v36 = vpop.xlane.xlu0 %505 }
 0x1cc   :  { %v507_v43 = vrot.slane %v506_v36, 4 }
 0x1ce   :  { %v508_v57 = vadd.f32 %v507_v43, %v506_v36 }
 0x1d0   :  { %v509_v32 = vrot.slane %v508_v57, 2 }
 0x1d2   :  { %v510_v0 = vadd.f32 %v509_v32, %v508_v57 }
 0x1d4   :  { %v511_v41 = vrot.slane %v510_v0, 1 }
 0x1d6   :  { %v512_v50 = vadd.f32 %v511_v41, %v510_v0 }
 0x1d8   :  { %667 = vpush %v512_v50 }
 0x209   :  { %s668_s1 = spop %667 }
 0x20a   :  { %s514_s26 = smul.f32 0.00048828125, %s668_s1 }
 0x20c   :  { %s519_s29 = smul.f32 %s515_s19, %s514_s26 }
 0x20e   :  { %v520_v6 = vstv %s519_s29 }
 0x20f   :  { %v521_v9 = vadd.f32 %v520_v6, %v517_v52  ;;  %v522_v11 = vadd.f32 %v520_v6, %v518_v3  ;;  %v529_v40 = vadd.f32 %v527_v4, %v520_v6  ;;  %v530_v12 = vadd.f32 %v528_v5, %v520_v6 }
 0x210   :  { %v537_v15 = vadd.f32 %v535_v58, %v520_v6  ;;  %v538_v28 = vadd.f32 %v536_v51, %v520_v6 }
 0x211   :  { %v523_v63 = vmax.f32 %v521_v9, 0.0  ;;  %v524_v20 = vmax.f32 %v522_v11, 0.0  ;;  %v531_v54 = vmax.f32 %v529_v40, 0.0  ;;  %v532_v14 = vmax.f32 %v530_v12, 0.0 }
 0x212   :  { %v539_v45 = vmax.f32 %v537_v15, 0.0  ;;  %v540_v61 = vmax.f32 %v538_v28, 0.0 }
 0x213   :  { %v525_v17 = vmin.f32 %v523_v63, 1.0  ;;  %v526_v18 = vmin.f32 %v524_v20, 1.0  ;;  %v533_v19 = vmin.f32 %v531_v54, 1.0  ;;  %v534_v59 = vmin.f32 %v532_v14, 1.0 }
 0x214   :  { %v541_v39 = vmin.f32 %v539_v45, 1.0  ;;  %v542_v21 = vmin.f32 %v540_v61, 1.0 }
 0x215   :  { %v553_v55 = vmul.f32 %v552_v34, %v525_v17  ;;  %v554_v22 = vmul.f32 %v552_v34, %v526_v18  ;;  %v556_v48 = vmul.f32 %v555_v7, %v533_v19  ;;  %v557_v42 = vmul.f32 %v555_v7, %v534_v59 }
 0x216   :  { %v561_v1 = vmul.f32 %v560_v8, %v541_v39  ;;  %v562_v2 = vmul.f32 %v560_v8, %v542_v21  ;;  %v577_v38 = vmul.f32 %v576_v37, %v525_v17  ;;  %v578_v49 = vmul.f32 %v576_v37, %v526_v18 }
 0x217   :  { %v580_v60 = vmul.f32 %v579_v31, %v533_v19  ;;  %v581_v24 = vmul.f32 %v579_v31, %v534_v59  ;;  %v585_v13 = vmul.f32 %v584_v46, %v541_v39  ;;  %v586_v62 = vmul.f32 %v584_v46, %v542_v21 }
 0x218   :  { %v602_v10 = vmul.f32 %v601_v56, %v525_v17  ;;  %v603_v23 = vmul.f32 %v601_v56, %v526_v18  ;;  %v605_v25 = vmul.f32 %v604_v53, %v533_v19  ;;  %v606_v16 = vmul.f32 %v604_v53, %v534_v59 }
 0x219   :  { %v610_v26 = vmul.f32 %v609_v47, %v541_v39  ;;  %v611_v27 = vmul.f32 %v609_v47, %v542_v21  ;;  %v558_v29 = vadd.f32 %v556_v48, %v553_v55  ;;  %v559_v30 = vadd.f32 %v557_v42, %v554_v22 }
 0x21a   :  { %v582_v33 = vadd.f32 %v580_v60, %v577_v38  ;;  %v583_v35 = vadd.f32 %v581_v24, %v578_v49  ;;  %v607_v36 = vadd.f32 %v605_v25, %v602_v10  ;;  %v608_v43 = vadd.f32 %v606_v16, %v603_v23 }
 0x21b   :  { %v563_v57 = vadd.f32 %v561_v1, %v558_v29  ;;  %v564_v32 = vadd.f32 %v562_v2, %v559_v30 }
 0x21c   :  { %v587_v0 = vadd.f32 %v585_v13, %v582_v33  ;;  %v588_v41 = vadd.f32 %v586_v62, %v583_v35  ;;  %v612_v50 = vadd.f32 %v610_v26, %v607_v36  ;;  %v613_v44 = vadd.f32 %v611_v27, %v608_v43 }
 0x21d   :  { %565 = vst [vmem:[#allocation9] sm:$0xff] %v563_v57 }
 0x21e   :  { %566 = vst [vmem:[#allocation9 + $0x8] sm:$0xff] %v564_v32 }
 0x21f   :  { %590 = vst [vmem:[#allocation9 + $0x10] sm:$0xff] %v587_v0 }
 0x220   :  { %591 = vst [vmem:[#allocation9 + $0x18] sm:$0xff] %v588_v41 }
 0x221   :  { %615 = vst [vmem:[#allocation9 + $0x20] sm:$0xff] %v612_v50 }
 0x222   :  { %616 = vst [vmem:[#allocation9 + $0x28] sm:$0xff] %v613_v44 }
 0x223   :  { %629 = dma.vmem_to_hbm [thread:$0]  %s622_s7, 768, %s624_s10, [#allocation4], %s770_s25, %s770_s25, %s771_s0  }
 0x224   :  { %765 = dma.done.wait [#allocation4], 768  }
 0x225   :  { %766 = vsyncadd [#allocation4], 4294966528 }
 0x226   :  { %634 = vsyncpa [#allocation3], 1 }
 0x227   :  { %635 = vsyncpa [#allocation4], 1 }
 0x228   :  { %636 = vsyncpa [#allocation5], 1 }
 0x229   :  { %637 = vsyncpa [#allocation7], 1 }

</bundles_post_ra>
